<compile_context>
chip_gen: v5e
topology: v5e:2x2
jax: 0.10.0
libtpu: 0.0.40
codegen_flags: <defaults>
</compile_context>

<pallas_src>
import functools

import jax
import jax.numpy as jnp
from jax import lax
from jax.experimental import pallas as pl
from jax.experimental.pallas import tpu as pltpu

EPS = 1e-5
_MIB = 1024 * 1024


def _derive_vmem_params():
    """Generation-aware (vmem_limit_bytes, per-tile byte budget)."""
    cap = 0
    try:
        info = pltpu.get_tpu_info()
        cap = int(getattr(info, "vmem_capacity_bytes", 0) or 0)
    except Exception:
        cap = 0
    if cap >= 96 * _MIB:            # v5e / v6e class: 128 MiB physical VMEM per core
        return 64 * _MIB, 8 * _MIB
    # v7x class (64 MiB physical) or unknown hardware: stay conservative.
    return 48 * _MIB, 6 * _MIB


_VMEM_LIMIT_BYTES, _TARGET_TILE_BYTES = _derive_vmem_params()


def _largest_divisor_tile(dim, align, max_tile):
    """Largest multiple of `align` dividing `dim`, <= max_tile.

    Returns None when `dim` is not a multiple of `align`; the caller then falls back to
    a full-dimension block (always a legal block shape) and re-budgets the other axis.
    """
    if dim % align != 0:
        return None
    t = min(dim, (max_tile // align) * align)
    while t >= align:
        if dim % t == 0:
            return t
        t -= align
    return align


def _pick_tiles(rows, hw, itemsize, row_align):
    """Lane-first, budget-aware (row_tile, hw_tile) selection."""
    # 1) Lane (HW) axis first: as wide as possible while leaving room for at least
    #    `row_align` rows inside the per-tile byte budget.
    max_hw_tile = max(128, (_TARGET_TILE_BYTES // (row_align * itemsize)) // 128 * 128)
    hw_tile = _largest_divisor_tile(hw, 128, max_hw_tile)
    if hw_tile is None:
        hw_tile = hw  # H*W not a multiple of 128: full-HW blocks (legal full-dim block).

    # 2) Row (N*C) axis: fill the remaining budget. This also bounds the footprint when
    #    hw_tile fell back to the full dimension (fixes the old budget-unaware fallback).
    max_row_tile = max(
        row_align,
        (_TARGET_TILE_BYTES // (hw_tile * itemsize)) // row_align * row_align,
    )
    row_tile = _largest_divisor_tile(rows, row_align, max_row_tile)
    if row_tile is None:
        row_tile = rows  # N*C not a multiple of the sublane pack: full-row blocks.
    return row_tile, hw_tile


# --------------------------------------------------------------------------- kernels


def _stats_kernel(x_ref, sum_ref, sumsq_ref):
    """Per-row sum(x) and sum(x*x) of one (row_tile, hw_tile) tile (pure map)."""
    x = x_ref[...].astype(jnp.float32)                       # (row_tile, hw_tile)
    sum_ref[0] = jnp.sum(x, axis=1, keepdims=True)           # (row_tile, 1)
    sumsq_ref[0] = jnp.sum(x * x, axis=1, keepdims=True)     # (row_tile, 1)


def _affine_kernel(scale_ref, shift_ref, x_ref, o_ref):
    """out = x * scale + shift, scale/shift broadcast along the lane (HW) axis."""
    x = x_ref[...].astype(jnp.float32)                       # (row_tile, hw_tile)
    o_ref[...] = (x * scale_ref[...] + shift_ref[...]).astype(o_ref.dtype)


# --------------------------------------------------------------------------- wrapper


@functools.partial(jax.jit, static_argnums=(3,))
def conditional_batch_norm_2d(x_nchw, y, embed_weight, num_features):
    """x_nchw: (N, C, H, W); y: (N,) int; embed_weight: (num_classes, 2*C)."""
    n, c, h, w = x_nchw.shape
    assert c == num_features
    hw = h * w
    rows = n * c
    itemsize = jnp.dtype(x_nchw.dtype).itemsize
    row_align = max(8, 32 // itemsize)          # 8 f32 / 16 bf16 / 32 int8-fp8 sublane pack

    # Free, contiguous reshape: channels on sublanes, spatial on lanes. No transpose.
    x2d = x_nchw.reshape(rows, hw)

    row_tile, hw_tile = _pick_tiles(rows, hw, itemsize, row_align)
    n_row_blocks = rows // row_tile
    n_hw_blocks = hw // hw_tile
    grid = (n_row_blocks, n_hw_blocks)

    x_spec = pl.BlockSpec((row_tile, hw_tile), lambda r, t: (r, t))
    # One tiny partial-stats block per (row_block, hw_block): pure map, no accumulation.
    part_spec = pl.BlockSpec((1, row_tile, 1), lambda r, t: (t, r, 0))

    # ---- Pass 1: per-row, per-HW-block partial sum / sumsq (fully parallel map). -----
    part_sum, part_sumsq = pl.pallas_call(
        _stats_kernel,
        grid=grid,
        in_specs=[x_spec],
        out_specs=(part_spec, part_spec),
        out_shape=(
            jax.ShapeDtypeStruct((n_hw_blocks, rows, 1), jnp.float32),
            jax.ShapeDtypeStruct((n_hw_blocks, rows, 1), jnp.float32),
        ),
        compiler_params=pltpu.CompilerParams(
            dimension_semantics=("parallel", "parallel"),
            vmem_limit_bytes=_VMEM_LIMIT_BYTES,
        ),
        cost_estimate=pl.CostEstimate(
            flops=3 * rows * hw,
            transcendentals=0,
            bytes_accessed=rows * hw * itemsize + 2 * n_hw_blocks * rows * 4,
        ),
    )(x2d)

    # ---- Tiny glue on (N, C): batch stats, embedding, fold gamma/beta -> scale/shift.
    count = jnp.float32(n * hw)                                # elements per channel
    row_sum = jnp.sum(part_sum, axis=0)[:, 0]                  # (rows,)
    row_sumsq = jnp.sum(part_sumsq, axis=0)[:, 0]              # (rows,)
    ch_sum = row_sum.reshape(n, c).sum(axis=0)                 # (C,)
    ch_sumsq = row_sumsq.reshape(n, c).sum(axis=0)             # (C,)
    mean = ch_sum / count
    var = jnp.maximum(ch_sumsq / count - mean * mean, 0.0)     # biased var (training BN)
    inv_std = lax.rsqrt(var + EPS)                             # (C,)

    emb = embed_weight[y].astype(jnp.float32)                  # (N, 2C) gather (JAX glue)
    gamma = emb[:, :num_features]                              # (N, C)
    beta = emb[:, num_features:]                               # (N, C)
    scale = gamma * inv_std[None, :]                           # (N, C)
    shift = beta - mean[None, :] * scale                       # (N, C)
    scale2d = scale.reshape(rows, 1)
    shift2d = shift.reshape(rows, 1)

    vec_spec = pl.BlockSpec((row_tile, 1), lambda r, t: (r, 0))

    # ---- Pass 2: normalize + conditional affine (both axes parallel). ----------------
    # NOTE: if the caller no longer needs x, adding input_output_aliases={2: 0} halves
    # the HBM footprint of this pass (not enabled here: the demo reuses x afterwards).
    out2d = pl.pallas_call(
        _affine_kernel,
        grid=grid,
        in_specs=[vec_spec, vec_spec, x_spec],
        out_specs=x_spec,
        out_shape=jax.ShapeDtypeStruct((rows, hw), x_nchw.dtype),
        compiler_params=pltpu.CompilerParams(
            dimension_semantics=("parallel", "parallel"),
            vmem_limit_bytes=_VMEM_LIMIT_BYTES,
        ),
        cost_estimate=pl.CostEstimate(
            flops=2 * rows * hw,
            transcendentals=0,
            bytes_accessed=2 * rows * hw * itemsize + 2 * rows * 4,
        ),
    )(scale2d, shift2d, x2d)

    return out2d.reshape(n, c, h, w)


# --------------------------------------------------------------------------- reference


def _reference(x_nchw, y, embed_weight, num_features):
    """Pure-JAX reference mirroring the PyTorch module (training-mode BN)."""
    x = x_nchw.astype(jnp.float32)
    mean = jnp.mean(x, axis=(0, 2, 3), keepdims=True)
    var = jnp.mean((x - mean) ** 2, axis=(0, 2, 3), keepdims=True)
    x_hat = (x - mean) / jnp.sqrt(var + EPS)
    emb = embed_weight[y]
    gamma = emb[:, :num_features].reshape(-1, num_features, 1, 1)
    beta = emb[:, num_features:].reshape(-1, num_features, 1, 1)
    return gamma * x_hat + beta


if __name__ == "__main__":
    N, C, H, W = 2, 4, 16, 16
    NUM_CLASSES = 10

    key = jax.random.PRNGKey(0)
    kx, ky, ke = jax.random.split(key, 3)

    x = jax.random.normal(kx, (N, C, H, W), dtype=jnp.float32)
    y = jax.random.randint(ky, (N,), 0, NUM_CLASSES, dtype=jnp.int32)

    # Embedding weights: first C columns ~ N(1, 0.02), last C columns zero
    # (matches the module's __init__).
    embed_weight = jnp.concatenate(
        [
            1.0 + 0.02 * jax.random.normal(ke, (NUM_CLASSES, C), dtype=jnp.float32),
            jnp.zeros((NUM_CLASSES, C), dtype=jnp.float32),
        ],
        axis=1,
    )

    out = conditional_batch_norm_2d(x, y, embed_weight, C)
    out = jax.block_until_ready(out)

    ref = _reference(x, y, embed_weight, C)
    assert out.shape == (N, C, H, W)
    assert jnp.allclose(out, ref, atol=1e-4, rtol=1e-4), (
        float(jnp.max(jnp.abs(out - ref)))
    )

    print("KERNEL_OK")
</pallas_src>

<mosaic_0001>
module attributes {stable_mosaic.version = 11 : i64} {
  func.func @_stats_kernel(%arg0: i32, %arg1: i32, %arg2: memref<8x256xf32, #tpu.memory_space<vmem>>, %arg3: memref<1x8x1xf32, #tpu.memory_space<vmem>>, %arg4: memref<1x8x1xf32, #tpu.memory_space<vmem>>) attributes {dimension_semantics = [#tpu.dimension_semantics<parallel>, #tpu.dimension_semantics<parallel>], iteration_bounds = array<i64: 1, 1>, scalar_prefetch = 0 : i64, scratch_operands = 0 : i64, tpu.core_type = #tpu.core_type<tc>, window_params = [{transform_indices = @transform_0, window_bounds = array<i64: 8, 256>}, {transform_indices = @transform_1, window_bounds = array<i64: 1, 8, 1>}, {transform_indices = @transform_2, window_bounds = array<i64: 1, 8, 1>}]} {
    %c0 = arith.constant 0 : index
    %c0_0 = arith.constant 0 : index
    %0 = vector.load %arg2[%c0, %c0_0] : memref<8x256xf32, #tpu.memory_space<vmem>>, vector<8x256xf32>
    %cst = arith.constant dense<0.000000e+00> : vector<8xf32>
    %1 = vector.multi_reduction <add>, %0, %cst [1] : vector<8x256xf32> to vector<8xf32>
    %2 = vector.shape_cast %1 : vector<8xf32> to vector<8x1xf32>
    %c0_1 = arith.constant 0 : index
    %c0_2 = arith.constant 0 : index
    %c0_3 = arith.constant 0 : index
    %3 = vector.load %arg3[%c0_1, %c0_2, %c0_3] : memref<1x8x1xf32, #tpu.memory_space<vmem>>, vector<1x8x1xf32>
    %4 = vector.shape_cast %3 : vector<1x8x1xf32> to vector<8x1xf32>
    %5 = vector.shape_cast %2 : vector<8x1xf32> to vector<1x8x1xf32>
    tpu.vector_store %arg3[%c0_1, %c0_2, %c0_3], %5 {strides = array<i32>} : memref<1x8x1xf32, #tpu.memory_space<vmem>>, vector<1x8x1xf32>,
    %6 = arith.mulf %0, %0 : vector<8x256xf32>
    %cst_4 = arith.constant dense<0.000000e+00> : vector<8xf32>
    %7 = vector.multi_reduction <add>, %6, %cst_4 [1] : vector<8x256xf32> to vector<8xf32>
    %8 = vector.shape_cast %7 : vector<8xf32> to vector<8x1xf32>
    %c0_5 = arith.constant 0 : index
    %c0_6 = arith.constant 0 : index
    %c0_7 = arith.constant 0 : index
    %9 = vector.load %arg4[%c0_5, %c0_6, %c0_7] : memref<1x8x1xf32, #tpu.memory_space<vmem>>, vector<1x8x1xf32>
    %10 = vector.shape_cast %9 : vector<1x8x1xf32> to vector<8x1xf32>
    %11 = vector.shape_cast %8 : vector<8x1xf32> to vector<1x8x1xf32>
    tpu.vector_store %arg4[%c0_5, %c0_6, %c0_7], %11 {strides = array<i32>} : memref<1x8x1xf32, #tpu.memory_space<vmem>>, vector<1x8x1xf32>,
    return
  }
  func.func @transform_0(%arg0: i32, %arg1: i32) -> (i32, i32) {
    %c0_i32 = arith.constant 0 : i32
    return %arg0, %arg1 : i32, i32
  }
  func.func @transform_1(%arg0: i32, %arg1: i32) -> (i32, i32, i32) {
    %c0_i32 = arith.constant 0 : i32
    %c0_i32_0 = arith.constant 0 : i32
    return %arg1, %arg0, %c0_i32 : i32, i32, i32
  }
  func.func @transform_2(%arg0: i32, %arg1: i32) -> (i32, i32, i32) {
    %c0_i32 = arith.constant 0 : i32
    %c0_i32_0 = arith.constant 0 : i32
    return %arg1, %arg0, %c0_i32 : i32, i32, i32
  }
}

module attributes {stable_mosaic.version = 11 : i64} {
  func.func @_affine_kernel(%arg0: i32, %arg1: i32, %arg2: memref<8x1xf32, #tpu.memory_space<vmem>>, %arg3: memref<8x1xf32, #tpu.memory_space<vmem>>, %arg4: memref<8x256xf32, #tpu.memory_space<vmem>>, %arg5: memref<8x256xf32, #tpu.memory_space<vmem>>) attributes {dimension_semantics = [#tpu.dimension_semantics<parallel>, #tpu.dimension_semantics<parallel>], iteration_bounds = array<i64: 1, 1>, scalar_prefetch = 0 : i64, scratch_operands = 0 : i64, tpu.core_type = #tpu.core_type<tc>, window_params = [{transform_indices = @transform_0, window_bounds = array<i64: 8, 1>}, {transform_indices = @transform_1, window_bounds = array<i64: 8, 1>}, {transform_indices = @transform_2, window_bounds = array<i64: 8, 256>}, {transform_indices = @transform_3, window_bounds = array<i64: 8, 256>}]} {
    %c0 = arith.constant 0 : index
    %c0_0 = arith.constant 0 : index
    %0 = vector.load %arg4[%c0, %c0_0] : memref<8x256xf32, #tpu.memory_space<vmem>>, vector<8x256xf32>
    %c0_1 = arith.constant 0 : index
    %c0_2 = arith.constant 0 : index
    %1 = vector.load %arg2[%c0_1, %c0_2] : memref<8x1xf32, #tpu.memory_space<vmem>>, vector<8x1xf32>
    %2 = vector.broadcast %1 : vector<8x1xf32> to vector<8x256xf32>
    %3 = arith.mulf %0, %2 : vector<8x256xf32>
    %c0_3 = arith.constant 0 : index
    %c0_4 = arith.constant 0 : index
    %4 = vector.load %arg3[%c0_3, %c0_4] : memref<8x1xf32, #tpu.memory_space<vmem>>, vector<8x1xf32>
    %5 = vector.broadcast %4 : vector<8x1xf32> to vector<8x256xf32>
    %6 = arith.addf %3, %5 : vector<8x256xf32>
    %c0_5 = arith.constant 0 : index
    %c0_6 = arith.constant 0 : index
    %7 = vector.load %arg5[%c0_5, %c0_6] : memref<8x256xf32, #tpu.memory_space<vmem>>, vector<8x256xf32>
    tpu.vector_store %arg5[%c0_5, %c0_6], %6 {strides = array<i32>} : memref<8x256xf32, #tpu.memory_space<vmem>>, vector<8x256xf32>,
    return
  }
  func.func @transform_0(%arg0: i32, %arg1: i32) -> (i32, i32) {
    %c0_i32 = arith.constant 0 : i32
    %c0_i32_0 = arith.constant 0 : i32
    return %arg0, %c0_i32 : i32, i32
  }
  func.func @transform_1(%arg0: i32, %arg1: i32) -> (i32, i32) {
    %c0_i32 = arith.constant 0 : i32
    %c0_i32_0 = arith.constant 0 : i32
    return %arg0, %c0_i32 : i32, i32
  }
  func.func @transform_2(%arg0: i32, %arg1: i32) -> (i32, i32) {
    %c0_i32 = arith.constant 0 : i32
    return %arg0, %arg1 : i32, i32
  }
  func.func @transform_3(%arg0: i32, %arg1: i32) -> (i32, i32) {
    %c0_i32 = arith.constant 0 : i32
    return %arg0, %arg1 : i32, i32
  }
}

</mosaic_0001>

<bundles_post_ra>
// kernel: squeeze.2
= control target key start
LH: loop header
LB: loop body
LE: loop exit
PB: predicated region body
PF: predicated region fallthrough
CT: control target
= control target key end

     0   :  { %vm7_vm0 = vcmask 31744   ;;  %s39_s0 = inlined_call_operand.vmem [shape: f32[8], index: 0, kind: input, shape index: {}]   ;;  %s40_s1 = inlined_call_operand.vmem [shape: f32[2,4], index: 1, kind: output, shape index: {}]  }
   0x1   :  { %v4_v0 = vld [vmem:[%s39_s0] sm:$0x1]  ;;  %s22_s0 = smov 124  }
   0x2   :  { %5 = vst [vmem:[#allocation1] sm:$0x1] %v4_v0 }
   0x9   :  { %v9_v1 = vld [vmem:[#allocation1] sm:$0x1]  }
   0xa   :  { %v6_v2 = vld [vmem:[#allocation1] sm:$0x1]   ;;  %10 = vrot.lane.b32.xlu0 %v9_v1, %s22_s0 }
   0xb   :  { %8 = vst.msk [vmem:[#allocation0] sm:$0x1] %vm7_vm0, %v6_v2  }
  0x7c   :  { %v11_v3 = vpop.permute.xlu0 %10  }
  0x7d   :  { %14 = vst.msk [vmem:[#allocation0 + $0x1] sm:$0x1] %vm7_vm0, %v11_v3  }
  0x84   :  { %v17_v4 = vld [vmem:[#allocation0] sm:$0x3] }
  0x85   :  { %20 = vst [vmem:[%s40_s1] sm:$0x3] %v17_v4 }

// kernel: conditional_batch_norm_2d.2
= control target key start
LH: loop header
LB: loop body
LE: loop exit
PB: predicated region body
PF: predicated region fallthrough
CT: control target
= control target key end

     0   :  { %vm15_vm0 = vcmask 7168   ;;  %s58_s0 = inlined_call_operand.vmem [shape: f32[8,256], index: 0, kind: input, shape index: {}]   ;;  %s59_s1 = inlined_call_operand.vmem [shape: f32[1,8,1], index: 1, kind: output, shape index: {0}]   ;;  %s60_s2 = inlined_call_operand.vmem [shape: f32[1,8,1], index: 2, kind: output, shape index: {1}]  }
   0x1   :  { %v10_v0 = vld [vmem:[%s58_s0] sm:$0xff]  ;;  %v11_v1 = vld [vmem:[%s58_s0 + $0x8] sm:$0xff] }
   0x2   :  { %v12_v2 = vadd.f32 %v11_v1, %v10_v0  ;;  %v17_v3 = vmul.f32 %v10_v0, %v10_v0  ;;  %v18_v4 = vmul.f32 %v11_v1, %v11_v1 }
   0x4   :  { %13 = vadd.xlane.f32.xlu0 %v12_v2  ;;  %v19_v5 = vadd.f32 %v18_v4, %v17_v3 }
   0xc   :  { %20 = vadd.xlane.f32.xlu0 %v19_v5 }
  0x77   :  { %v14_v6 = vpop.xlane.xlu0 %13 }
  0x78   :  { %16 = vst.msk [vmem:[%s59_s1] sm:$0xff] %vm15_vm0, %v14_v6 }
  0x7f   :  { %v21_v7 = vpop.xlane.xlu0 %20 }
  0x80   :  { %22 = vst.msk [vmem:[%s60_s2] sm:$0xff] %vm15_vm0, %v21_v7 }

// kernel: conditional_batch_norm_2d.3
= control target key start
LH: loop header
LB: loop body
LE: loop exit
PB: predicated region body
PF: predicated region fallthrough
CT: control target
= control target key end

     0   :  { %v40_v0 = vmov 0   ;;  %s79_s0 = inlined_call_operand.vmem [shape: f32[8,1], index: 0, kind: input, shape index: {}]   ;;  %s80_s1 = inlined_call_operand.vmem [shape: f32[8,1], index: 1, kind: input, shape index: {}]   ;;  %s81_s2 = inlined_call_operand.vmem [shape: f32[8,256], index: 2, kind: input, shape index: {}]   ;;  %s82_s3 = inlined_call_operand.vmem [shape: f32[8,256], index: 3, kind: output, shape index: {}]  }
   0x1   :  { %39 = vset.pattern.permute.xlu0 %v40_v0  ;;  %v16_v1 = vld [vmem:[%s79_s0] sm:$0xff]  ;;  %v15_v5 = vld [vmem:[%s81_s2 + $0x8] sm:$0xff] }
   0x2   :  { %19 = vperm.xlu0 %39, %v16_v1   ;;  %v24_v2 = vld [vmem:[%s80_s1] sm:$0xff] }
   0x3   :  { %v14_v4 = vld [vmem:[%s81_s2] sm:$0xff] }
   0xa   :  { %27 = vperm.xlu0 %39, %v24_v2  }
  0x74   :  { %v20_v3 = vpop.permute.xlu0 %19 }
  0x75   :  { %v22_v6 = vmul.f32 %v20_v3, %v14_v4  ;;  %v23_v7 = vmul.f32 %v20_v3, %v15_v5 }
  0x7c   :  { %v28_v8 = vpop.permute.xlu0 %27 }
  0x7d   :  { %v30_v9 = vadd.f32 %v28_v8, %v22_v6  ;;  %v31_v10 = vadd.f32 %v28_v8, %v23_v7 }
  0x7f   :  { %32 = vst [vmem:[%s82_s3] sm:$0xff] %v30_v9 }
  0x80   :  { %33 = vst [vmem:[%s82_s3 + $0x8] sm:$0xff] %v31_v10 }

</bundles_post_ra>
